<compile_context>
chip_gen: v6e
topology: v6e:2x2x1
jax: 0.10.0
libtpu: 0.0.40
codegen_flags: <defaults>
</compile_context>

<pallas_src>
import functools

import jax
import jax.numpy as jnp
from jax.experimental import pallas as pl
from jax.experimental.pallas import tpu as pltpu

BN_EPS = 1e-5
H_PAD = 128  # lane-dense hidden width (hidden_channels padded up to one full vreg lane width)


# ----------------------------------------------------------------------------
# Kernels
# ----------------------------------------------------------------------------
def _fused_kernel(x_ref, w1_ref, vecs_ref, w2_ref, o_ref):
    """Single-shot fast path: whole batch resident in VMEM, one invocation."""
    x = x_ref[...]                                                      # (B, N) f32

    # Linear 1 (bf16 operands, f32 accumulation on the MXU).
    h = jnp.dot(x.astype(jnp.bfloat16), w1_ref[...],
                preferred_element_type=jnp.float32) + vecs_ref[0:1, :]  # (B, H_PAD) f32

    # BatchNorm1d (training-mode, biased variance), folded into one affine.
    # NOTE: E[h^2]-mean^2 can lose precision vs (h-mean)^2 when |mean| >> std; the clamp
    # prevents NaN and is adequate for RL-scale activations.
    inv_b = 1.0 / h.shape[0]
    mean = jnp.sum(h, axis=0, keepdims=True) * inv_b
    var = jnp.maximum(jnp.sum(h * h, axis=0, keepdims=True) * inv_b - mean * mean, 0.0)
    scale = vecs_ref[1:2, :] * jax.lax.rsqrt(var + BN_EPS)              # gamma folded in
    shift = vecs_ref[2:3, :] - mean * scale                             # beta  folded in
    a = jnp.maximum(h * scale + shift, 0.0)                             # ReLU

    # Linear 2 (+ Identity output activation).
    out = jnp.dot(a.astype(jnp.bfloat16), w2_ref[...],
                  preferred_element_type=jnp.float32) + vecs_ref[3:4, :]
    o_ref[...] = out.astype(o_ref.dtype)


def _stats_kernel(x_ref, w1_ref, vecs_ref, ss_ref, sum_ref, sumsq_ref,
                  *, batch, tile_b, ragged):
    """Pass 1 (grid over batch tiles, 'arbitrary'): BN batch statistics.

    Accumulates per-feature sum / sum-of-squares of h = x@W1 + b1 and, on the last tile,
    folds them (with gamma/beta) into one affine:
        scale = gamma * rsqrt(var + eps),  shift = beta - mean * scale
    emitted as the (2, H_PAD) output [scale; shift].  No (B, 128) output writeback here.
    """
    i = pl.program_id(0)
    last = pl.num_programs(0) - 1

    h = jnp.dot(x_ref[...].astype(jnp.bfloat16), w1_ref[...],
                preferred_element_type=jnp.float32) + vecs_ref[0:1, :]  # (tile_b, H_PAD)

    @pl.when(i == 0)
    def _():
        sum_ref[...] = jnp.zeros_like(sum_ref)
        sumsq_ref[...] = jnp.zeros_like(sumsq_ref)

    def _accum_full():
        sum_ref[...] += jnp.sum(h, axis=0, keepdims=True)
        sumsq_ref[...] += jnp.sum(h * h, axis=0, keepdims=True)

    if ragged:
        # Only the last tile contains batch-padding rows: mask there, stay unmasked elsewhere.
        @pl.when(i == last)
        def _():
            row = jax.lax.broadcasted_iota(jnp.int32, (tile_b, 1), 0) + i * tile_b
            valid = (row < batch).astype(jnp.float32)
            hm = h * valid
            sum_ref[...] += jnp.sum(hm, axis=0, keepdims=True)
            sumsq_ref[...] += jnp.sum(hm * h, axis=0, keepdims=True)    # = sum(valid * h^2)

        @pl.when(i != last)
        def _():
            _accum_full()
    else:
        _accum_full()

    @pl.when(i == last)
    def _():
        inv_b = 1.0 / batch
        mean = sum_ref[...] * inv_b
        var = jnp.maximum(sumsq_ref[...] * inv_b - mean * mean, 0.0)
        scale = vecs_ref[1:2, :] * jax.lax.rsqrt(var + BN_EPS)
        shift = vecs_ref[2:3, :] - mean * scale
        ss_ref[0:1, :] = scale
        ss_ref[1:2, :] = shift


def _norm_kernel(x_ref, w1_ref, vecs_ref, w2_ref, ss_ref, o_ref):
    """Pass 2 (grid over batch tiles, 'parallel'): Linear1 -> BN affine + ReLU -> Linear2."""
    h = jnp.dot(x_ref[...].astype(jnp.bfloat16), w1_ref[...],
                preferred_element_type=jnp.float32) + vecs_ref[0:1, :]
    a = jnp.maximum(h * ss_ref[0:1, :] + ss_ref[1:2, :], 0.0)
    out = jnp.dot(a.astype(jnp.bfloat16), w2_ref[...],
                  preferred_element_type=jnp.float32) + vecs_ref[3:4, :]
    o_ref[...] = out.astype(o_ref.dtype)


# ----------------------------------------------------------------------------
# Cost estimates (per call, counting the actual traffic of that call)
# ----------------------------------------------------------------------------
def _fused_cost(batch, obs_dim, out_bytes):
    flops = (2 * batch * obs_dim * H_PAD + 2 * batch * H_PAD * H_PAD + 10 * batch * H_PAD)
    bytes_accessed = (batch * obs_dim * 4 + obs_dim * H_PAD * 2 + 8 * H_PAD * 4
                      + H_PAD * H_PAD * 2 + batch * H_PAD * out_bytes)
    return pl.CostEstimate(flops=flops, transcendentals=H_PAD, bytes_accessed=bytes_accessed)


def _stats_cost(b_pad, obs_dim):
    flops = 2 * b_pad * obs_dim * H_PAD + 5 * b_pad * H_PAD
    bytes_accessed = (b_pad * obs_dim * 4 + obs_dim * H_PAD * 2 + 8 * H_PAD * 4 + 2 * H_PAD * 4)
    return pl.CostEstimate(flops=flops, transcendentals=H_PAD, bytes_accessed=bytes_accessed)


def _norm_cost(b_pad, obs_dim, out_bytes):
    flops = (2 * b_pad * obs_dim * H_PAD + 2 * b_pad * H_PAD * H_PAD + 5 * b_pad * H_PAD)
    bytes_accessed = (b_pad * obs_dim * 4 + obs_dim * H_PAD * 2 + 8 * H_PAD * 4
                      + H_PAD * H_PAD * 2 + 2 * H_PAD * 4 + b_pad * H_PAD * out_bytes)
    return pl.CostEstimate(flops=flops, transcendentals=0, bytes_accessed=bytes_accessed)


# ----------------------------------------------------------------------------
# Wrappers
# ----------------------------------------------------------------------------
def _forward_single(x, params, out_dtype):
    B, N = x.shape
    vmem = pl.BlockSpec(memory_space=pltpu.MemorySpace.VMEM)
    return pl.pallas_call(
        _fused_kernel,
        out_shape=jax.ShapeDtypeStruct((B, H_PAD), out_dtype),
        in_specs=[vmem] * 4,
        out_specs=vmem,
        compiler_params=pltpu.CompilerParams(vmem_limit_bytes=32 * 1024 * 1024),
        cost_estimate=_fused_cost(B, N, jnp.dtype(out_dtype).itemsize),
    )(x, params["w1"], params["vecs"], params["w2"])


def _forward_tiled(x, params, tile_b, out_dtype):
    B, N = x.shape
    assert tile_b % 8 == 0
    n_bt = pl.cdiv(B, tile_b)
    b_pad = n_bt * tile_b
    ragged = b_pad != B
    if ragged:
        x = jnp.pad(x, ((0, b_pad - B), (0, 0)))

    w1, vecs, w2 = params["w1"], params["vecs"], params["w2"]
    out_bytes = jnp.dtype(out_dtype).itemsize

    x_spec = pl.BlockSpec((tile_b, N), lambda i: (i, 0))        # streamed per batch tile
    w1_spec = pl.BlockSpec((N, H_PAD), lambda i: (0, 0))        # grid-invariant (resident)
    vecs_spec = pl.BlockSpec((8, H_PAD), lambda i: (0, 0))      # packed b1/gamma/beta/b2
    w2_spec = pl.BlockSpec((H_PAD, H_PAD), lambda i: (0, 0))    # grid-invariant (resident)
    ss_spec = pl.BlockSpec((2, H_PAD), lambda i: (0, 0))        # folded BN affine
    # NOTE: grid-invariant specs could use pipeline_mode=pl.Buffered(1) to save ~48 KiB of
    # double-buffer VMEM; left at the default since VMEM is nowhere near a constraint here.

    # ---- Pass 1: BN statistics -> folded (scale, shift).  Reduction over batch tiles. ----
    stats_kernel = functools.partial(_stats_kernel, batch=B, tile_b=tile_b, ragged=ragged)
    ss = pl.pallas_call(
        stats_kernel,
        out_shape=jax.ShapeDtypeStruct((2, H_PAD), jnp.float32),
        grid_spec=pltpu.PrefetchScalarGridSpec(
            num_scalar_prefetch=0,
            grid=(n_bt,),
            in_specs=[x_spec, w1_spec, vecs_spec],
            out_specs=ss_spec,
            scratch_shapes=[pltpu.VMEM((1, H_PAD), jnp.float32),    # sum(h)
                            pltpu.VMEM((1, H_PAD), jnp.float32)],   # sum(h^2)
        ),
        compiler_params=pltpu.CompilerParams(dimension_semantics=("arbitrary",)),
        cost_estimate=_stats_cost(b_pad, N),
    )(x, w1, vecs)

    # ---- Pass 2: normalize + ReLU + Linear2.  Batch tiles are independent -> "parallel"
    # (megacore shards this across both TensorCores on v7x). ----
    out = pl.pallas_call(
        _norm_kernel,
        out_shape=jax.ShapeDtypeStruct((b_pad, H_PAD), out_dtype),
        grid_spec=pltpu.PrefetchScalarGridSpec(
            num_scalar_prefetch=0,
            grid=(n_bt,),
            in_specs=[x_spec, w1_spec, vecs_spec, w2_spec, ss_spec],
            out_specs=pl.BlockSpec((tile_b, H_PAD), lambda i: (i, 0)),
        ),
        compiler_params=pltpu.CompilerParams(dimension_semantics=("parallel",)),
        cost_estimate=_norm_cost(b_pad, N, out_bytes),
    )(x, w1, vecs, w2, ss)
    return out, b_pad


def representation_network_mlp(x, params, *, tile_b=1024, single_shot_max_b=4096,
                               out_dtype=jnp.float32, unpad=True):
    """Forward pass of RepresentationNetworkMLP.  x: (B, obs_dim) float32.

    unpad=True  -> returns (B, hidden_channels), matching the PyTorch module exactly.
    unpad=False -> returns the lane-padded (B, H_PAD) buffer (padded lanes are exactly 0),
                   avoiding the wrapper-side slice copy; un-pad at the final consumer.
    out_dtype   -> set to jnp.bfloat16 if downstream tolerates it (halves output writeback).
    """
    B, N = x.shape
    hidden = params["hidden"]
    # Rough single-shot VMEM footprint: x (f32 + bf16 copy) + h/a/out intermediates + slack.
    single_bytes = B * (6 * N + 14 * H_PAD) + (N + H_PAD) * H_PAD * 2
    if B <= single_shot_max_b and single_bytes <= 24 * 1024 * 1024:
        out, b_pad = _forward_single(x, params, out_dtype), B
    else:
        out, b_pad = _forward_tiled(x, params, tile_b, out_dtype)
    if unpad:
        return out[:B, :hidden]
    return out if b_pad == B else out[:B]


# ----------------------------------------------------------------------------
# Parameter construction (packed / lane-padded layout)
# ----------------------------------------------------------------------------
def init_params(key, observation_shape, hidden_channels,
                last_linear_layer_init_zero=True):
    assert hidden_channels <= H_PAD
    k1, k2, k3, k4 = jax.random.split(key, 4)
    bound1 = 1.0 / jnp.sqrt(observation_shape)
    w1 = jax.random.uniform(k1, (observation_shape, hidden_channels),
                            jnp.float32, -bound1, bound1)
    b1 = jax.random.uniform(k2, (hidden_channels,), jnp.float32, -bound1, bound1)
    gamma = jnp.ones((hidden_channels,), jnp.float32)
    beta = jnp.zeros((hidden_channels,), jnp.float32)
    if last_linear_layer_init_zero:
        w2 = jnp.zeros((hidden_channels, hidden_channels), jnp.float32)
        b2 = jnp.zeros((hidden_channels,), jnp.float32)
    else:
        bound2 = 1.0 / jnp.sqrt(hidden_channels)
        w2 = jax.random.uniform(k3, (hidden_channels, hidden_channels),
                                jnp.float32, -bound2, bound2)
        b2 = jax.random.uniform(k4, (hidden_channels,), jnp.float32, -bound2, bound2)

    # Lane-pad weights to H_PAD and store them bf16 (MXU-native operands, half the DMA bytes).
    w1p = jnp.zeros((observation_shape, H_PAD), jnp.float32).at[:, :hidden_channels].set(w1)
    w2p = jnp.zeros((H_PAD, H_PAD), jnp.float32).at[:hidden_channels, :hidden_channels].set(w2)

    # Pack the four (H,) vectors into one (8, H_PAD) slab -> one VMEM tile, one DMA.
    # Rows: 0=b1, 1=gamma, 2=beta, 3=b2.  Padded gamma/beta/b2 stay 0 so padded lanes stay 0.
    vecs = jnp.zeros((8, H_PAD), jnp.float32)
    vecs = vecs.at[0, :hidden_channels].set(b1)
    vecs = vecs.at[1, :hidden_channels].set(gamma)
    vecs = vecs.at[2, :hidden_channels].set(beta)
    vecs = vecs.at[3, :hidden_channels].set(b2)

    return {"w1": w1p.astype(jnp.bfloat16),
            "w2": w2p.astype(jnp.bfloat16),
            "vecs": vecs,
            "hidden": hidden_channels}


def reference_forward(x, p):
    """Pure-JAX reference mirroring the kernel's bf16-operand / f32-accumulate semantics."""
    w1 = p["w1"].astype(jnp.float32)
    w2 = p["w2"].astype(jnp.float32)
    b1, gamma, beta, b2 = (p["vecs"][i:i + 1] for i in range(4))
    h = x.astype(jnp.bfloat16).astype(jnp.float32) @ w1 + b1
    mean = jnp.mean(h, axis=0, keepdims=True)
    var = jnp.mean((h - mean) ** 2, axis=0, keepdims=True)
    hn = (h - mean) * jax.lax.rsqrt(var + BN_EPS) * gamma + beta
    a = jnp.maximum(hn, 0.0)
    out = a.astype(jnp.bfloat16).astype(jnp.float32) @ w2 + b2
    return out[:, :p["hidden"]]


# TODO(synk): PyTorch BatchNorm1d's training-mode side-effect of updating running_mean /
# running_var (momentum buffers) is not emitted; only the forward output is computed.


# ----------------------------------------------------------------------------
# Self-test
# ----------------------------------------------------------------------------
if __name__ == "__main__":
    OBS, HIDDEN = 16, 32
    key = jax.random.PRNGKey(0)
    kx, kx2, kx3, kp, kp2 = jax.random.split(key, 5)

    # ---- Small-batch fused path (single invocation) ----
    B = 8
    x = jax.random.normal(kx, (B, OBS), jnp.float32)

    params = init_params(kp, OBS, HIDDEN, last_linear_layer_init_zero=True)
    out = jax.block_until_ready(representation_network_mlp(x, params))
    ref = reference_forward(x, params)
    assert out.shape == (B, HIDDEN)
    assert jnp.allclose(out, ref, atol=1e-3, rtol=1e-3)

    params_nz = init_params(kp2, OBS, HIDDEN, last_linear_layer_init_zero=False)
    out_nz = jax.block_until_ready(representation_network_mlp(x, params_nz))
    ref_nz = reference_forward(x, params_nz)
    assert jnp.allclose(out_nz, ref_nz, atol=1e-3, rtol=1e-3)

    # ---- Tiled two-call path, ragged batch (not a multiple of the tile) ----
    B_big = 300
    x_big = jax.random.normal(kx2, (B_big, OBS), jnp.float32)
    out_big = jax.block_until_ready(
        representation_network_mlp(x_big, params_nz, tile_b=128, single_shot_max_b=64))
    ref_big = reference_forward(x_big, params_nz)
    assert out_big.shape == (B_big, HIDDEN)
    assert jnp.allclose(out_big, ref_big, atol=1e-3, rtol=1e-3)

    # ---- Tiled two-call path, exact multiple of the tile (unmasked stats path) ----
    B_even = 256
    x_even = jax.random.normal(kx3, (B_even, OBS), jnp.float32)
    out_even = jax.block_until_ready(
        representation_network_mlp(x_even, params_nz, tile_b=128, single_shot_max_b=64))
    ref_even = reference_forward(x_even, params_nz)
    assert out_even.shape == (B_even, HIDDEN)
    assert jnp.allclose(out_even, ref_even, atol=1e-3, rtol=1e-3)

    print("KERNEL_OK")
</pallas_src>

<mosaic_0001>
module attributes {stable_mosaic.version = 11 : i64} {
  func.func @_fused_kernel(%arg0: memref<8x16xf32, #tpu.memory_space<vmem>>, %arg1: memref<16x128xbf16, #tpu.memory_space<vmem>>, %arg2: memref<8x128xf32, #tpu.memory_space<vmem>>, %arg3: memref<128x128xbf16, #tpu.memory_space<vmem>>, %arg4: memref<8x128xf32, #tpu.memory_space<vmem>>) attributes {dimension_semantics = [], scalar_prefetch = 0 : i64, scratch_operands = 0 : i64, tpu.core_type = #tpu.core_type<tc>} {
    %c0 = arith.constant 0 : index
    %c0_0 = arith.constant 0 : index
    %0 = vector.load %arg0[%c0, %c0_0] : memref<8x16xf32, #tpu.memory_space<vmem>>, vector<8x16xf32>
    %1 = arith.truncf %0 : vector<8x16xf32> to vector<8x16xbf16>
    %c0_1 = arith.constant 0 : index
    %c0_2 = arith.constant 0 : index
    %2 = vector.load %arg1[%c0_1, %c0_2] : memref<16x128xbf16, #tpu.memory_space<vmem>>, vector<16x128xbf16>
    %cst = arith.constant dense<0.000000e+00> : vector<8x128xf32>
    %3 = tpu.matmul %1, %2, %cst {dimension_numbers = #tpu.dot_dimension_numbers<[1], [0], [0], [1], [0, 0, 1, 1], [], []>} : vector<8x16xbf16>, vector<16x128xbf16>, vector<8x128xf32> -> vector<8x128xf32>
    %c0_3 = arith.constant 0 : index
    %c0_4 = arith.constant 0 : index
    %4 = vector.load %arg2[%c0_3, %c0_4] : memref<8x128xf32, #tpu.memory_space<vmem>>, vector<1x128xf32>
    %5 = vector.broadcast %4 : vector<1x128xf32> to vector<8x128xf32>
    %6 = arith.addf %3, %5 : vector<8x128xf32>
    %cst_5 = arith.constant dense<0.000000e+00> : vector<128xf32>
    %7 = vector.multi_reduction <add>, %6, %cst_5 [0] : vector<8x128xf32> to vector<128xf32>
    %8 = vector.shape_cast %7 : vector<128xf32> to vector<1x128xf32>
    %cst_6 = arith.constant 1.250000e-01 : f32
    %9 = vector.broadcast %cst_6 : f32 to vector<1x128xf32>
    %10 = arith.mulf %8, %9 : vector<1x128xf32>
    %11 = arith.mulf %6, %6 : vector<8x128xf32>
    %cst_7 = arith.constant dense<0.000000e+00> : vector<128xf32>
    %12 = vector.multi_reduction <add>, %11, %cst_7 [0] : vector<8x128xf32> to vector<128xf32>
    %13 = vector.shape_cast %12 : vector<128xf32> to vector<1x128xf32>
    %cst_8 = arith.constant 1.250000e-01 : f32
    %14 = vector.broadcast %cst_8 : f32 to vector<1x128xf32>
    %15 = arith.mulf %13, %14 : vector<1x128xf32>
    %16 = arith.mulf %10, %10 : vector<1x128xf32>
    %17 = arith.subf %15, %16 : vector<1x128xf32>
    %cst_9 = arith.constant 0.000000e+00 : f32
    %18 = vector.broadcast %cst_9 : f32 to vector<1x128xf32>
    %19 = arith.maximumf %17, %18 : vector<1x128xf32>
    %c1 = arith.constant 1 : index
    %c0_10 = arith.constant 0 : index
    %20 = vector.load %arg2[%c1, %c0_10] : memref<8x128xf32, #tpu.memory_space<vmem>>, vector<1x128xf32>
    %cst_11 = arith.constant 9.99999974E-6 : f32
    %21 = vector.broadcast %cst_11 : f32 to vector<1x128xf32>
    %22 = arith.addf %19, %21 : vector<1x128xf32>
    %23 = math.rsqrt %22 : vector<1x128xf32>
    %24 = arith.mulf %20, %23 : vector<1x128xf32>
    %c2 = arith.constant 2 : index
    %c0_12 = arith.constant 0 : index
    %25 = vector.load %arg2[%c2, %c0_12] : memref<8x128xf32, #tpu.memory_space<vmem>>, vector<1x128xf32>
    %26 = arith.mulf %10, %24 : vector<1x128xf32>
    %27 = arith.subf %25, %26 : vector<1x128xf32>
    %28 = vector.broadcast %24 : vector<1x128xf32> to vector<8x128xf32>
    %29 = arith.mulf %6, %28 : vector<8x128xf32>
    %30 = vector.broadcast %27 : vector<1x128xf32> to vector<8x128xf32>
    %31 = arith.addf %29, %30 : vector<8x128xf32>
    %cst_13 = arith.constant 0.000000e+00 : f32
    %32 = vector.broadcast %cst_13 : f32 to vector<8x128xf32>
    %33 = arith.maximumf %31, %32 : vector<8x128xf32>
    %34 = arith.truncf %33 : vector<8x128xf32> to vector<8x128xbf16>
    %c0_14 = arith.constant 0 : index
    %c0_15 = arith.constant 0 : index
    %35 = vector.load %arg3[%c0_14, %c0_15] : memref<128x128xbf16, #tpu.memory_space<vmem>>, vector<128x128xbf16>
    %cst_16 = arith.constant dense<0.000000e+00> : vector<8x128xf32>
    %36 = tpu.matmul %34, %35, %cst_16 {dimension_numbers = #tpu.dot_dimension_numbers<[1], [0], [0], [1], [0, 0, 1, 1], [], []>} : vector<8x128xbf16>, vector<128x128xbf16>, vector<8x128xf32> -> vector<8x128xf32>
    %c3 = arith.constant 3 : index
    %c0_17 = arith.constant 0 : index
    %37 = vector.load %arg2[%c3, %c0_17] : memref<8x128xf32, #tpu.memory_space<vmem>>, vector<1x128xf32>
    %38 = vector.broadcast %37 : vector<1x128xf32> to vector<8x128xf32>
    %39 = arith.addf %36, %38 : vector<8x128xf32>
    %c0_18 = arith.constant 0 : index
    %c0_19 = arith.constant 0 : index
    %40 = vector.load %arg4[%c0_18, %c0_19] : memref<8x128xf32, #tpu.memory_space<vmem>>, vector<8x128xf32>
    tpu.vector_store %arg4[%c0_18, %c0_19], %39 {strides = array<i32>} : memref<8x128xf32, #tpu.memory_space<vmem>>, vector<8x128xf32>,
    return
  }
}

</mosaic_0001>

<bundles_post_ra>
// kernel: tpu_custom_call.1
= control target key start
LH: loop header
LB: loop body
LE: loop exit
PB: predicated region body
PF: predicated region fallthrough
CT: control target
= control target key end

     0   :  { %9 = vsyncpa [#allocation3], 0  ;;  %s525_s0 = inlined_call_operand.hbm [shape: f32[8,16], index: 0, kind: input, shape index: {}]   ;;  %s526_s1 = inlined_call_operand.hbm [shape: bf16[16,128], index: 1, kind: input, shape index: {}]   ;;  %s527_s2 = inlined_call_operand.hbm [shape: f32[8,128], index: 2, kind: input, shape index: {}]   ;;  %s528_s3 = inlined_call_operand.hbm [shape: bf16[128,128], index: 3, kind: input, shape index: {}]   ;;  %s529_s4 = inlined_call_operand.hbm [shape: f32[8,128], index: 4, kind: output, shape index: {}]  }
   0x1   :  { %10 = vsyncpa [#allocation6], 0 }
   0x2   :  { %11 = vsyncpa [#allocation9], 0 }
   0x3   :  { %12 = vsyncpa [#allocation4], 0  ;;  %s470_s15 = smov [#allocation5]  }
   0x4   :  { %s28_s16 = sshll.u32 %s470_s15, 4  ;;  %s29_s16 = int_to_ptr.vmem [resolvable:$true] %s28_s16 }
   0x5   :  { %s370_s17 = scalar_lea.vmem %s29_s16, 128  ;;  %p375_p1 = scmp.lt.s32.totalorder %s29_s16, %s29_s16 }
   0x6   :  { %p371_p0 = scmp.ne.s32.totalorder %s29_s16, %s370_s17  ;;  %p376_p2 = scmp.lt.s32.totalorder %s370_s17, %s370_s17 }
   0x8   :  { %p377_p3 = por %p376_p2, %p375_p1 }
   0xa   :  { %p378_p4 = pnand %p377_p3, %p371_p0 }
   0xc   :  { %381 = shalt.err (!%p378_p4)
}
   0xd   :  { %s471_s18 = smov 64   ;;  %s472_s19 = smov 4  }
   0xe   :  { %34 = dma.hbm_to_vmem [thread:$0]  %s526_s1, 128, %s29_s16, [#allocation6], %s471_s18, %s471_s18, %s472_s19  }
   0xf   :  { %s473_s22 = smov [#allocation2]   ;;  %s474_s24 = smov [#allocation7]  }
  0x10   :  { %s19_s23 = sshll.u32 %s473_s22, 4  ;;  %s41_s25 = sshll.u32 %s474_s24, 4  ;;  %s20_s23 = int_to_ptr.vmem [resolvable:$true] %s19_s23  ;;  %s42_s25 = int_to_ptr.vmem [resolvable:$true] %s41_s25 }
  0x11   :  { %s390_s26 = scalar_lea.vmem %s20_s23, 128  ;;  %p395_p6 = scmp.lt.s32.totalorder %s20_s23, %s20_s23 }
  0x12   :  { %p391_p5 = scmp.ne.s32.totalorder %s20_s23, %s390_s26  ;;  %p396_p7 = scmp.lt.s32.totalorder %s390_s26, %s390_s26 }
  0x14   :  { %p397_p8 = por %p396_p7, %p395_p6 }
  0x16   :  { %p398_p9 = pnand %p397_p8, %p391_p5 }
  0x18   :  { %401 = shalt.err (!%p398_p9)
}
  0x19   :  { %22 = dma.hbm_to_vmem [thread:$0]  %s525_s0, 128, %s20_s23, [#allocation3]  }
  0x1a   :  { %s410_s29 = scalar_lea.vmem %s42_s25, 128  ;;  %p415_p11 = scmp.lt.s32.totalorder %s42_s25, %s42_s25 }
  0x1b   :  { %p411_p10 = scmp.ne.s32.totalorder %s42_s25, %s410_s29  ;;  %p416_p12 = scmp.lt.s32.totalorder %s410_s29, %s410_s29 }
  0x1d   :  { %p417_p13 = por %p416_p12, %p415_p11 }
  0x1f   :  { %p418_p0 = pnand %p417_p13, %p411_p10 }
  0x21   :  { %421 = shalt.err (!%p418_p0)
}
  0x22   :  { %44 = dma.hbm_to_vmem [thread:$0]  %s527_s2, 128, %s42_s25, [#allocation6]  }
  0x23   :  { %s475_s5 = smov [#allocation8]  }
  0x24   :  { %s50_s6 = sshll.u32 %s475_s5, 4  ;;  %s51_s6 = int_to_ptr.vmem [resolvable:$true] %s50_s6 }
  0x25   :  { %s430_s7 = scalar_lea.vmem %s51_s6, 1024  ;;  %p435_p2 = scmp.lt.s32.totalorder %s51_s6, %s51_s6 }
  0x26   :  { %p431_p1 = scmp.ne.s32.totalorder %s51_s6, %s430_s7  ;;  %p436_p3 = scmp.lt.s32.totalorder %s430_s7, %s430_s7 }
  0x28   :  { %p437_p4 = por %p436_p3, %p435_p2 }
  0x2a   :  { %p438_p5 = pnand %p437_p4, %p431_p1 }
  0x2c   :  { %441 = shalt.err (!%p438_p5)
}
  0x2d   :  { %56 = dma.hbm_to_vmem [thread:$0]  %s528_s3, 1024, %s51_s6, [#allocation9], %s471_s18, %s471_s18, %s472_s19  }
  0x2e   :  { %462 = dma.done.wait [#allocation3], 128  }
  0x2f   :  { %463 = vsyncadd [#allocation3], 4294967168 }
  0x30   :  { %464 = dma.done.wait [#allocation6], 256  }
  0x31   :  { %465 = vsyncadd [#allocation6], 4294967040 }
  0x32   :  { %466 = dma.done.wait [#allocation9], 1024  }
  0x33   :  { %467 = vsyncadd [#allocation9], 4294966272  ;;  %v476_v0 = vmov 0.0   ;;  %vm477_vm0 = vmmov 0   ;;  %v351_v1 = vld [vmem:[#allocation5] sm:$0xff]   ;;  %v70_v2 = vld [vmem:[#allocation2] sm:$0xff]  ;;  %v154_v37 = vlaneseq }
  0x34   :  { %316 = vmatprep.subr.bf16.mxu0 %v476_v0  ;;  %318 = vmatprep.mubr.msk.bf16.mxu0 %vm477_vm0, %v476_v0  ;;  %vm85_vm1 = vcmask 130048   ;;  %v71_v3 = vpack.c.bf16 %v70_v2, %v70_v2  ;;  %v352_v4 = vld [vmem:[#allocation8 + $0x38] sm:$0xff]   ;;  %v353_v5 = vld [vmem:[#allocation8 + $0x30] sm:$0xff]   ;;  %v354_v6 = vld [vmem:[#allocation8 + $0x28] sm:$0xff]   ;;  %s478_s2 = smov [#allocation10]  }
  0x35   :  { %322 = vmatprep.subr.bf16.mxu1 %v476_v0  ;;  %338 = vmatprep.mubr.msk.bf16.mxu1 %vm477_vm0, %v476_v0  ;;  %v355_v7 = vld [vmem:[#allocation8 + $0x20] sm:$0xff]   ;;  %v356_v8 = vld [vmem:[#allocation8 + $0x18] sm:$0xff]   ;;  %v357_v9 = vld [vmem:[#allocation8 + $0x10] sm:$0xff]   ;;  %v155_v38 = vshrl.u32 %v154_v37, 7  ;;  %s282_s3 = sshll.u32 %s478_s2, 4  ;;  %s283_s3 = int_to_ptr.vmem [resolvable:$true] %s282_s3 }
  0x36   :  { %317 = vmatpush3.bf16.msra.mxu0 %v351_v1  ;;  %323 = vmatpush3.bf16.msra.mxu1 %v352_v4  ;;  %v358_v10 = vld [vmem:[#allocation8 + $0x8] sm:$0xff]   ;;  %v359_v11 = vld [vmem:[#allocation8] sm:$0xff]   ;;  %v293_v12 = vld [vmem:[#allocation7] ss:$0 sm:$0xff]  ;;  %s442_s9 = scalar_lea.vmem %s283_s3, 128  ;;  %p447_p7 = scmp.lt.s32.totalorder %s283_s3, %s283_s3 }
  0x37   :  { %324 = vmatprep.subr.bf16.mxu1 %v476_v0  ;;  %v147_v39 = vld [vmem:[#allocation7 + $0x1] sm:$0x1]  ;;  %v156_v40 = vsub.s32 0, %v155_v38  ;;  %v151_v43 = vld [vmem:[#allocation7 + $0x2] sm:$0x1]  ;;  %p443_p6 = scmp.ne.s32.totalorder %s283_s3, %s442_s9  ;;  %p448_p8 = scmp.lt.s32.totalorder %s442_s9, %s442_s9 }
  0x38   :  { %v296_v52 = vld [vmem:[#allocation7 + $0x3] ss:$0 sm:$0xff] }
  0x39   :  { %319 = vmatmul.mubr.msk.bf16.vlgmr.msra.gmra.mxu0 %vm85_vm1, %v71_v3  ;;  %p449_p9 = por %p448_p8, %p447_p7 }
  0x3a   :  { %325 = vmatpush3.bf16.msra.mxu1 %v353_v5 }
  0x3b   :  { %326 = vmatprep.subr.bf16.mxu1 %v476_v0  ;;  %p450_p10 = pnand %p449_p9, %p443_p6 }
  0x3e   :  { %327 = vmatpush3.bf16.msra.mxu1 %v354_v6 }
  0x3f   :  { %328 = vmatprep.subr.bf16.mxu1 %v476_v0 }
  0x42   :  { %329 = vmatpush3.bf16.msra.mxu1 %v355_v7 }
  0x43   :  { %330 = vmatprep.subr.bf16.mxu1 %v476_v0 }
  0x46   :  { %331 = vmatpush3.bf16.msra.mxu1 %v356_v8 }
  0x47   :  { %332 = vmatprep.subr.bf16.mxu1 %v476_v0 }
  0x4a   :  { %333 = vmatpush3.bf16.msra.mxu1 %v357_v9 }
  0x4b   :  { %334 = vmatprep.subr.bf16.mxu1 %v476_v0 }
  0x4e   :  { %335 = vmatpush3.bf16.msra.mxu1 %v358_v10 }
  0x4f   :  { %336 = vmatprep.subr.bf16.mxu1 %v476_v0 }
  0x52   :  { %337 = vmatpush3.bf16.msra.mxu1 %v359_v11 }
  0xf9   :  { %v123_v13 = vpop.f32.mrf.mxu0 }
  0xfa   :  { %v124_v14 = vadd.f32 %v293_v12, %v123_v13 }
  0xfb   :  { %v320_v15 = vpop.f32.mrf.mxu0 }
  0xfc   :  { %v129_v16 = vrot.slane %v124_v14, 4  ;;  %v136_v17 = vmul.f32 %v124_v14, %v124_v14 }
  0xfd   :  { %v126_v18 = vpop.f32.mrf.mxu0 }
  0xfe   :  { %v130_v19 = vadd.f32 %v129_v16, %v124_v14  ;;  %v137_v20 = vrot.slane %v136_v17, 4 }
  0xff   :  { %v321_v21 = vpop.f32.mrf.mxu0 }
 0x100   :  { %v131_v22 = vrot.slane %v130_v19, 2  ;;  %v138_v23 = vadd.f32 %v137_v20, %v136_v17 }
 0x102   :  { %v132_v24 = vadd.f32 %v131_v22, %v130_v19  ;;  %v139_v25 = vrot.slane %v138_v23, 2 }
 0x104   :  { %v133_v26 = vrot.slane %v132_v24, 1  ;;  %v140_v27 = vadd.f32 %v139_v25, %v138_v23 }
 0x106   :  { %v134_v28 = vadd.f32 %v133_v26, %v132_v24  ;;  %v141_v29 = vrot.slane %v140_v27, 1 }
 0x108   :  { %v142_v30 = vadd.f32 %v141_v29, %v140_v27  ;;  %v135_v31 = vmul.f32 0.125, %v134_v28 }
 0x10a   :  { %v143_v32 = vmul.f32 0.125, %v142_v30  ;;  %v144_v33 = vmul.f32 %v135_v31, %v135_v31 }
 0x10c   :  { %v145_v34 = vsub.f32 %v143_v32, %v144_v33 }
 0x10e   :  { %v146_v35 = vmax.f32 %v145_v34, 0.0 }
 0x110   :  { %v148_v36 = vadd.f32 1e-05, %v146_v35 }
 0x112   :  { %360 = vrsqrt.f32 %v148_v36 }
 0x11f   :  { %v361_v41 = vpop.eup %360 }
 0x120   :  { %v150_v42 = vmul.f32 %v361_v41, %v147_v39 }
 0x122   :  { %v152_v44 = vmul.f32 %v150_v42, %v135_v31  ;;  %v157_v45 = vrot.slane %v150_v42, %v156_v40 }
 0x124   :  { %v153_v46 = vsub.f32 %v151_v43, %v152_v44  ;;  %v158_v47 = vmul.f32 %v157_v45, %v124_v14 }
 0x126   :  { %v162_v48 = vrot.slane %v153_v46, %v156_v40 }
 0x128   :  { %v163_v49 = vadd.f32 %v162_v48, %v158_v47 }
 0x12a   :  { %v164_v50 = vmax.f32 %v163_v49, 0.0 }
 0x12c   :  { %v165_v51 = vpack.c.bf16 %v164_v50, %v164_v50 }
 0x12e   :  { %339 = vmatmul.mubr.bf16.vlgmr.msra.gmra.mxu1 %v165_v51 }
 0x1ee   :  { %v269_v53 = vpop.f32.mrf.mxu1 }
 0x1ef   :  { %v270_v54 = vadd.f32 %v296_v52, %v269_v53 }
 0x1f0   :  { %v340_v55 = vpop.f32.mrf.mxu1 }
 0x1f1   :  { %275 = vst [vmem:[#allocation10] sm:$0xff] %v270_v54 }
 0x1f2   :  { %v272_v56 = vpop.f32.mrf.mxu1 }
 0x1f3   :  { %453 = shalt.err (!%p450_p10)
}
 0x1f4   :  { %285 = dma.vmem_to_hbm [thread:$0]  %s283_s3, 128, %s529_s4, [#allocation4]   ;;  %v341_v57 = vpop.f32.mrf.mxu1 }
 0x1f5   :  { %468 = dma.done.wait [#allocation4], 128  }
 0x1f6   :  { %469 = vsyncadd [#allocation4], 4294967168 }
 0x1f7   :  { %289 = vsyncpa [#allocation3], 1 }
 0x1f8   :  { %290 = vsyncpa [#allocation6], 1 }
 0x1f9   :  { %291 = vsyncpa [#allocation9], 1 }
 0x1fa   :  { %292 = vsyncpa [#allocation4], 1 }

</bundles_post_ra>
